<compile_context>
chip_gen: v7x
topology: tpu7x:2x2x1
jax: 0.10.0
libtpu: 0.0.40
codegen_flags: <defaults>
</compile_context>

<pallas_src>
import functools

import jax
import jax.numpy as jnp
from jax import lax
from jax.experimental import pallas as pl
from jax.experimental.pallas import tpu as pltpu


def _cdiv(a, b):
    return -(-a // b)


def _round_up(x, m):
    return _cdiv(x, m) * m


# ----------------------------------------------------------------------------
# Per-generation tuning knobs (guarded hardware queries with safe fallbacks)
# ----------------------------------------------------------------------------
def _tpu_query():
    vmem_cap = 64 * 1024 * 1024          # conservative default (v7x physical)
    num_tc = 1
    try:
        info = pltpu.get_tpu_info()
        cap = getattr(info, "vmem_capacity_bytes", None)
        if cap:
            vmem_cap = int(cap)
    except Exception:
        pass
    try:
        kind = jax.devices()[0].device_kind.lower()
        if ("v7" in kind) or ("7x" in kind):
            num_tc = 2                   # v7x: 2 TensorCores per chip
    except Exception:
        pass
    return vmem_cap, num_tc


_VMEM_CAP, _NUM_TC = _tpu_query()
# ~half of physical VMEM: 64 MiB on 128-MiB v5e/v6e, 32 MiB on 64-MiB v7x.
VMEM_LIMIT = int(min(max(_VMEM_CAP // 2, 32 * 1024 * 1024), 96 * 1024 * 1024))
TM_MAX = 1024 if VMEM_LIMIT >= 48 * 1024 * 1024 else 512
TK_MAX = 2048


def _pick_tm(M):
    tm = min(TM_MAX, _round_up(M, 8))
    # Only dual-TensorCore chips (v7x) benefit from >=2 M tiles; v5e/v6e keep
    # the single largest tile (fewer grid steps, larger MXU M).
    if _NUM_TC > 1 and M > 512:
        tm = min(tm, max(256, _round_up(_cdiv(M, _NUM_TC), 8)))
    return max(tm, 8)


def _pick_tk(K):
    # 128-aligned divisor of K (K = 27*Cin for the im2col GEMM) so no padding
    # of the patches matrix is ever needed.
    tk = K
    while tk > TK_MAX and tk % 3 == 0 and (tk // 3) % 128 == 0:
        tk //= 3
    return tk


# ----------------------------------------------------------------------------
# Padded-plane layout (PPL) helpers
#   (N, D, RP, C), RP = (H+3)*wp, wp = round_up(W+2, 8)
#   valid data at rows (h+1)*wp + (w+1); zeros everywhere else.
# ----------------------------------------------------------------------------
def _wp(W):
    return _round_up(W + 2, 8)


def to_ppl(x, dtype):
    N, D, H, W, C = x.shape
    wp = _wp(W)
    xp = jnp.pad(x.astype(dtype),
                 ((0, 0), (0, 0), (1, 2), (1, wp - W - 1), (0, 0)))
    return xp.reshape(N, D, (H + 3) * wp, C)


def from_ppl(y, H, W):
    N, D, RP, C = y.shape
    wp = RP // (H + 3)
    return y.reshape(N, D, H + 3, wp, C)[:, :, 1:H + 1, 1:W + 1, :]


# ----------------------------------------------------------------------------
# Kernel 1: fused GEMM  (patches @ W_scaled) + shift [+ relu]
# (used for the strided conv1 im2col and the 1x1x1 downsample conv)
# ----------------------------------------------------------------------------
def _gemm_bn_kernel_1k(p_ref, w_ref, shift_ref, o_ref, *, relu):
    out = jnp.dot(p_ref[...], w_ref[...],
                  preferred_element_type=jnp.float32) + shift_ref[...]
    if relu:
        out = jnp.maximum(out, 0.0)
    o_ref[...] = out.astype(o_ref.dtype)


def _gemm_bn_kernel_nk(p_ref, w_ref, shift_ref, o_ref, acc_ref, *, relu, tk):
    k = pl.program_id(1)

    @pl.when(k == 0)
    def _init():
        acc_ref[...] = jnp.zeros_like(acc_ref)

    if tk % 128 == 0:
        start = pl.multiple_of(k * tk, 128)
    else:
        start = k * tk
    acc_ref[...] += jnp.dot(p_ref[...], w_ref[pl.ds(start, tk), :],
                            preferred_element_type=jnp.float32)

    @pl.when(k == pl.num_programs(1) - 1)
    def _epilogue():
        out = acc_ref[...] + shift_ref[...]
        if relu:
            out = jnp.maximum(out, 0.0)
        o_ref[...] = out.astype(o_ref.dtype)


def gemm_bn_act(patches, w_mat, shift, relu, out_dtype):
    """patches (M, K) @ w_mat (K, C) + shift (1, C), optional ReLU."""
    M, K = patches.shape
    C = w_mat.shape[1]
    patches = patches.astype(jnp.bfloat16)
    w_mat = w_mat.astype(jnp.bfloat16)          # BN scale already folded in
    shift = shift.astype(jnp.float32)

    tk = _pick_tk(K)
    nk = K // tk
    tm = _pick_tm(M)
    nm = _cdiv(M, tm)       # ragged last tile handled by Pallas boundary clip

    if nk == 1:
        # Fast path: no K blocking, no f32 scratch, straight store.
        return pl.pallas_call(
            functools.partial(_gemm_bn_kernel_1k, relu=relu),
            out_shape=jax.ShapeDtypeStruct((M, C), out_dtype),
            grid_spec=pltpu.PrefetchScalarGridSpec(
                num_scalar_prefetch=0,
                grid=(nm,),
                in_specs=[
                    pl.BlockSpec((tm, K), lambda i: (i, 0)),    # patches
                    pl.BlockSpec((K, C), lambda i: (0, 0)),     # resident W
                    pl.BlockSpec((1, C), lambda i: (0, 0)),     # BN shift
                ],
                out_specs=pl.BlockSpec((tm, C), lambda i: (i, 0)),
            ),
            compiler_params=pltpu.CompilerParams(
                dimension_semantics=("parallel",),
                vmem_limit_bytes=VMEM_LIMIT),
        )(patches, w_mat, shift)

    # K-blocked path: weight stays resident (constant index), sliced in-kernel.
    return pl.pallas_call(
        functools.partial(_gemm_bn_kernel_nk, relu=relu, tk=tk),
        out_shape=jax.ShapeDtypeStruct((M, C), out_dtype),
        grid_spec=pltpu.PrefetchScalarGridSpec(
            num_scalar_prefetch=0,
            grid=(nm, nk),
            in_specs=[
                pl.BlockSpec((tm, tk), lambda i, k: (i, k)),    # patches
                pl.BlockSpec((K, C), lambda i, k: (0, 0)),      # resident W
                pl.BlockSpec((1, C), lambda i, k: (0, 0)),      # BN shift
            ],
            out_specs=pl.BlockSpec((tm, C), lambda i, k: (i, 0)),
            scratch_shapes=[pltpu.VMEM((tm, C), jnp.float32)],
        ),
        compiler_params=pltpu.CompilerParams(
            dimension_semantics=("parallel", "arbitrary"),
            vmem_limit_bytes=VMEM_LIMIT),
    )(patches, w_mat, shift)


# ----------------------------------------------------------------------------
# Kernel 2: direct 3x3x3 / stride 1 / pad 1 conv + shift [+ residual] [+ relu]
# Input and output are both in PPL; each depth slab is read from HBM once.
# ----------------------------------------------------------------------------
def _conv3x3s1_kernel(x_ref, w_ref, shift_ref, *rest, wp, H, W, relu, has_res):
    if has_res:
        res_ref, o_ref = rest
    else:
        (o_ref,) = rest

    d = pl.program_id(1)
    nd = pl.num_programs(1)
    RP = o_ref.shape[2]
    Cout = o_ref.shape[3]
    nrows = H * wp                       # multiple of 8 (wp is)

    acc = jnp.zeros((nrows, Cout), jnp.float32)
    # Depth taps are an in-kernel loop over the VMEM-resident volume, so the
    # HBM read of x is 1x (v2 re-fetched every slab 3x via a grid axis).
    for a in range(3):
        src = d + (a - 1)
        dd = jnp.clip(src, 0, nd - 1)    # clamp; out-of-range taps are gated
        tap = jnp.zeros((nrows, Cout), jnp.float32)
        for b in range(3):
            for c in range(3):
                off = b * wp + c
                lhs = x_ref[0, dd, pl.ds(off, nrows), :]
                tap = tap + jnp.dot(lhs, w_ref[9 * a + 3 * b + c],
                                    preferred_element_type=jnp.float32)
        if a == 1:
            acc = acc + tap
        else:
            gate = jnp.logical_and(src >= 0, src < nd).astype(jnp.float32)
            acc = acc + gate * tap

    band = acc + shift_ref[...]
    # Re-embed the H*wp band into the padded-plane layout: aligned concat of a
    # zero tail, then one static f32 roll by (wp+1) rows (XLU slot).
    full = jnp.concatenate(
        [band, jnp.zeros((RP - nrows, Cout), jnp.float32)], axis=0)
    full = pltpu.roll(full, shift=wp + 1, axis=0)
    if has_res:
        full = full + res_ref[0, 0].astype(jnp.float32)
    if relu:
        full = jnp.maximum(full, 0.0)
    # Zero pad rows/cols so the output stays directly consumable as the next
    # conv's pre-padded input (PPL invariant).
    r = lax.broadcasted_iota(jnp.int32, (RP, 1), 0)
    rr = r // wp
    rc = r % wp
    valid = (rr >= 1) & (rr <= H) & (rc >= 1) & (rc <= W)
    full = jnp.where(valid, full, 0.0)
    o_ref[0, 0] = full.astype(o_ref.dtype)


def conv3x3s1_bn_act(x_ppl, H, W, w, shift, residual_ppl, relu, out_dtype):
    """Direct 3x3x3 / stride 1 / pad 1 conv + BN shift [+ residual] [+ relu].

    x_ppl: (N, D, RP, Cin) in PPL (zeros at pads); w: (3,3,3,Cin,Cout) with BN
    scale pre-folded; shift: (1, Cout) f32; residual_ppl: (N, D, RP, Cout) in
    PPL (any float dtype) or None.  Output is (N, D, RP, Cout) in PPL.
    """
    N, D, RP, Cin = x_ppl.shape
    wp = RP // (H + 3)
    assert RP == (H + 3) * wp and wp % 8 == 0
    Cout = w.shape[-1]
    w27 = w.astype(jnp.bfloat16).reshape(27, Cin, Cout)

    in_specs = [
        # Whole padded volume of one batch element; constant across d, so it
        # is DMA'd from HBM once per n.
        pl.BlockSpec((1, D, RP, Cin), lambda n, d: (n, 0, 0, 0)),
        # All 27 weight taps, resident (constant index map).
        pl.BlockSpec((27, Cin, Cout), lambda n, d: (0, 0, 0)),
        pl.BlockSpec((1, Cout), lambda n, d: (0, 0)),            # BN shift
    ]
    args = [x_ppl, w27, shift.astype(jnp.float32)]
    if residual_ppl is not None:
        in_specs.append(
            pl.BlockSpec((1, 1, RP, Cout), lambda n, d: (n, d, 0, 0)))
        args.append(residual_ppl)

    return pl.pallas_call(
        functools.partial(_conv3x3s1_kernel, wp=wp, H=H, W=W, relu=relu,
                          has_res=residual_ppl is not None),
        out_shape=jax.ShapeDtypeStruct((N, D, RP, Cout), out_dtype),
        grid_spec=pltpu.PrefetchScalarGridSpec(
            num_scalar_prefetch=0,
            grid=(N, D),
            in_specs=in_specs,
            out_specs=pl.BlockSpec((1, 1, RP, Cout),
                                   lambda n, d: (n, d, 0, 0)),
        ),
        compiler_params=pltpu.CompilerParams(
            dimension_semantics=("parallel", "parallel"),
            vmem_limit_bytes=VMEM_LIMIT),
    )(*args)


# ----------------------------------------------------------------------------
# Glue: im2col (strided conv1 only), BN folding, block wiring
# ----------------------------------------------------------------------------
def extract_patches_3d(x, ksize, stride, padding):
    """x: (N, D, H, W, C) -> ((N*Do*Ho*Wo, kd*kh*kw*C), (N, Do, Ho, Wo))."""
    N, D, H, W, C = x.shape
    kd, kh, kw = ksize
    sd, sh, sw = stride
    pd, ph, pw = padding
    xp = jnp.pad(x, ((0, 0), (pd, pd), (ph, ph), (pw, pw), (0, 0)))
    Do = (D + 2 * pd - kd) // sd + 1
    Ho = (H + 2 * ph - kh) // sh + 1
    Wo = (W + 2 * pw - kw) // sw + 1
    slabs = []
    for a in range(kd):
        for b in range(kh):
            for c in range(kw):
                slabs.append(xp[:, a:a + Do * sd:sd,
                                b:b + Ho * sh:sh,
                                c:c + Wo * sw:sw, :])
    patches = jnp.concatenate(slabs, axis=-1)
    return patches.reshape(N * Do * Ho * Wo, kd * kh * kw * C), (N, Do, Ho, Wo)


def bn_fold(gamma, beta, mean, var, eps=1e-5):
    scale = gamma / jnp.sqrt(var + eps)
    shift = beta - mean * scale
    return scale.reshape(1, -1), shift.reshape(1, -1)


def basic_block_3d(x, params, stride):
    """Forward of BasicBlock3D.  x: (N, D, H, W, Cin) float32 (NDHWC)."""
    N, D, H, W, Cin = x.shape
    stride = tuple(stride)
    w1, w2 = params["w1"], params["w2"]
    Cout = w1.shape[-1]

    s1, b1 = bn_fold(*params["bn1"])
    s2, b2 = bn_fold(*params["bn2"])
    # Fold BN scale into the conv weights once (wrapper-side); kernels only
    # add the folded shift in the f32 epilogue.
    w1f = (w1 * s1).astype(jnp.bfloat16)
    w2f = (w2 * s2).astype(jnp.bfloat16)
    x_bf = x.astype(jnp.bfloat16)

    # ---- conv1 (3x3x3, stride, pad 1) + bn1 + relu -> bf16 activation ----
    if stride == (1, 1, 1):
        x_ppl = to_ppl(x_bf, jnp.bfloat16)
        out1_ppl = conv3x3s1_bn_act(x_ppl, H, W, w1f, b1, residual_ppl=None,
                                    relu=True, out_dtype=jnp.bfloat16)
        Do, Ho, Wo = D, H, W
    else:
        p1, (n, Do, Ho, Wo) = extract_patches_3d(x_bf, (3, 3, 3), stride,
                                                 (1, 1, 1))
        out1 = gemm_bn_act(p1, w1f.reshape(-1, Cout), b1, relu=True,
                           out_dtype=jnp.bfloat16)
        out1_ppl = to_ppl(out1.reshape(n, Do, Ho, Wo, Cout), jnp.bfloat16)
        x_ppl = None

    # ---- identity path ----
    if "wd" in params:
        sd_, bd_ = bn_fold(*params["bnd"])
        wdf = (params["wd"] * sd_).astype(jnp.bfloat16)
        xs = x_bf[:, ::stride[0], ::stride[1], ::stride[2], :]
        n_, do_, ho_, wo_, _ = xs.shape
        ident = gemm_bn_act(xs.reshape(-1, Cin), wdf.reshape(Cin, Cout), bd_,
                            relu=False, out_dtype=jnp.float32)
        identity_ppl = to_ppl(ident.reshape(n_, do_, ho_, wo_, Cout),
                              jnp.float32)
    elif stride == (1, 1, 1):
        # Residual is the already-padded bf16 input (no extra pad pass; the
        # add itself happens in f32 inside the conv2 epilogue).
        identity_ppl = x_ppl
    else:
        identity_ppl = to_ppl(
            x[:, ::stride[0], ::stride[1], ::stride[2], :], jnp.float32)

    # ---- conv2 (3x3x3, stride 1, pad 1) + bn2 + residual + relu ----
    out_ppl = conv3x3s1_bn_act(out1_ppl, Ho, Wo, w2f, b2,
                               residual_ppl=identity_ppl, relu=True,
                               out_dtype=jnp.float32)
    return from_ppl(out_ppl, Ho, Wo)


# ----------------------------------------------------------------------------
# Deterministic parameter init (shapes from nn.Conv3d / nn.BatchNorm3d)
# ----------------------------------------------------------------------------
def init_params(key, in_ch, out_ch, downsample):
    ks = jax.random.split(key, 16)

    def bn_params(k0, k1, k2, k3, ch):
        return (jax.random.normal(k0, (ch,), jnp.float32) * 0.1 + 1.0,  # gamma
                jax.random.normal(k1, (ch,), jnp.float32) * 0.1,        # beta
                jax.random.normal(k2, (ch,), jnp.float32) * 0.1,        # mean
                jax.random.uniform(k3, (ch,), jnp.float32, 0.5, 1.5))   # var

    p = {
        "w1": jax.random.normal(ks[0], (3, 3, 3, in_ch, out_ch),
                                jnp.float32) * 0.1,
        "w2": jax.random.normal(ks[1], (3, 3, 3, out_ch, out_ch),
                                jnp.float32) * 0.1,
        "bn1": bn_params(ks[2], ks[3], ks[4], ks[5], out_ch),
        "bn2": bn_params(ks[6], ks[7], ks[8], ks[9], out_ch),
    }
    if downsample:
        p["wd"] = jax.random.normal(ks[10], (1, 1, 1, in_ch, out_ch),
                                    jnp.float32) * 0.1
        p["bnd"] = bn_params(ks[11], ks[12], ks[13], ks[14], out_ch)
    return p


# ----------------------------------------------------------------------------
# Pure-JAX reference for verification
# ----------------------------------------------------------------------------
def ref_block(x, params, stride):
    def conv(x, w, st, pad):
        return lax.conv_general_dilated(
            x, w, window_strides=st, padding=[(pad, pad)] * 3,
            dimension_numbers=("NDHWC", "DHWIO", "NDHWC"))

    def bn(x, bnp, eps=1e-5):
        g, b, m, v = bnp
        return (x - m) / jnp.sqrt(v + eps) * g + b

    out = jax.nn.relu(bn(conv(x, params["w1"], stride, 1), params["bn1"]))
    out = bn(conv(out, params["w2"], (1, 1, 1), 1), params["bn2"])
    if "wd" in params:
        identity = bn(conv(x, params["wd"], stride, 0), params["bnd"])
    else:
        identity = x
    return jax.nn.relu(out + identity)


if __name__ == "__main__":
    key = jax.random.PRNGKey(0)
    kx, kp1, kp2 = jax.random.split(key, 3)

    # Torch input (N=2, C=4, D=8, H=8, W=8) NCDHW -> NDHWC (2, 8, 8, 8, 4).
    x = jax.random.normal(kx, (2, 8, 8, 8, 4), jnp.float32)

    # bf16 MXU operands (f32 accumulation) -> tolerances loosened vs pure f32.
    tol = dict(atol=1e-1, rtol=1e-1)

    # Case 1: channel change + stride (2,2,2): strided GEMM conv1 + downsample.
    params1 = init_params(kp1, 4, 8, downsample=True)
    out1 = jax.block_until_ready(basic_block_3d(x, params1, (2, 2, 2)))
    ref1 = ref_block(x, params1, (2, 2, 2))
    assert out1.shape == ref1.shape == (2, 4, 4, 4, 8)
    assert jnp.allclose(out1, ref1, **tol), float(jnp.max(jnp.abs(out1 - ref1)))

    # Case 2: same channels, stride (1,1,1): direct conv path, plain identity.
    params2 = init_params(kp2, 4, 4, downsample=False)
    out2 = jax.block_until_ready(basic_block_3d(x, params2, (1, 1, 1)))
    ref2 = ref_block(x, params2, (1, 1, 1))
    assert out2.shape == ref2.shape == (2, 8, 8, 8, 4)
    assert jnp.allclose(out2, ref2, **tol), float(jnp.max(jnp.abs(out2 - ref2)))

    print("KERNEL_OK")
</pallas_src>

<mosaic_0001>
module attributes {stable_mosaic.version = 11 : i64} {
  func.func @_gemm_bn_kernel_1k(%arg0: i32, %arg1: memref<128x108xbf16, #tpu.memory_space<vmem>>, %arg2: memref<108x8xbf16, #tpu.memory_space<vmem>>, %arg3: memref<1x8xf32, #tpu.memory_space<vmem>>, %arg4: memref<128x8xbf16, #tpu.memory_space<vmem>>) attributes {dimension_semantics = [#tpu.dimension_semantics<parallel>], iteration_bounds = array<i64: 1>, scalar_prefetch = 0 : i64, scratch_operands = 0 : i64, tpu.core_type = #tpu.core_type<tc>, window_params = [{transform_indices = @transform_0, window_bounds = array<i64: 128, 108>}, {pipeline_mode = #tpu.pipeline_mode<synchronous>, transform_indices = @transform_1, window_bounds = array<i64: 108, 8>}, {pipeline_mode = #tpu.pipeline_mode<synchronous>, transform_indices = @transform_2, window_bounds = array<i64: 1, 8>}, {transform_indices = @transform_3, window_bounds = array<i64: 128, 8>}]} {
    %c0 = arith.constant 0 : index
    %c0_0 = arith.constant 0 : index
    %0 = vector.load %arg1[%c0, %c0_0] : memref<128x108xbf16, #tpu.memory_space<vmem>>, vector<128x108xbf16>
    %c0_1 = arith.constant 0 : index
    %c0_2 = arith.constant 0 : index
    %1 = vector.load %arg2[%c0_1, %c0_2] : memref<108x8xbf16, #tpu.memory_space<vmem>>, vector<108x8xbf16>
    %cst = arith.constant dense<0.000000e+00> : vector<128x8xf32>
    %2 = tpu.matmul %0, %1, %cst {dimension_numbers = #tpu.dot_dimension_numbers<[1], [0], [0], [1], [0, 0, 1, 1], [], []>} : vector<128x108xbf16>, vector<108x8xbf16>, vector<128x8xf32> -> vector<128x8xf32>
    %c0_3 = arith.constant 0 : index
    %c0_4 = arith.constant 0 : index
    %3 = vector.load %arg3[%c0_3, %c0_4] : memref<1x8xf32, #tpu.memory_space<vmem>>, vector<1x8xf32>
    %4 = vector.broadcast %3 : vector<1x8xf32> to vector<128x8xf32>
    %5 = arith.addf %2, %4 : vector<128x8xf32>
    %cst_5 = arith.constant 0.000000e+00 : f32
    %6 = vector.broadcast %cst_5 : f32 to vector<128x8xf32>
    %7 = arith.maximumf %5, %6 : vector<128x8xf32>
    %8 = arith.truncf %7 : vector<128x8xf32> to vector<128x8xbf16>
    %c0_6 = arith.constant 0 : index
    %c0_7 = arith.constant 0 : index
    %9 = vector.load %arg4[%c0_6, %c0_7] : memref<128x8xbf16, #tpu.memory_space<vmem>>, vector<128x8xbf16>
    tpu.vector_store %arg4[%c0_6, %c0_7], %8 {strides = array<i32>} : memref<128x8xbf16, #tpu.memory_space<vmem>>, vector<128x8xbf16>,
    return
  }
  func.func @transform_0(%arg0: i32) -> (i32, i32) {
    %c0_i32 = arith.constant 0 : i32
    %c0_i32_0 = arith.constant 0 : i32
    return %arg0, %c0_i32 : i32, i32
  }
  func.func @transform_1(%arg0: i32) -> (i32, i32) {
    %c0_i32 = arith.constant 0 : i32
    %c0_i32_0 = arith.constant 0 : i32
    %c0_i32_1 = arith.constant 0 : i32
    return %c0_i32, %c0_i32_0 : i32, i32
  }
  func.func @transform_2(%arg0: i32) -> (i32, i32) {
    %c0_i32 = arith.constant 0 : i32
    %c0_i32_0 = arith.constant 0 : i32
    %c0_i32_1 = arith.constant 0 : i32
    return %c0_i32, %c0_i32_0 : i32, i32
  }
  func.func @transform_3(%arg0: i32) -> (i32, i32) {
    %c0_i32 = arith.constant 0 : i32
    %c0_i32_0 = arith.constant 0 : i32
    return %arg0, %c0_i32 : i32, i32
  }
}

</mosaic_0001>

<bundles_post_ra>
// kernel: tpu_custom_call.1
= control target key start
LH: loop header
LB: loop body
LE: loop exit
PB: predicated region body
PF: predicated region fallthrough
CT: control target
= control target key end

     0   :  { %vm133_vm0 = vcmask 883712   ;;  %vm158_vm1 = vcmask 1045504   ;;  %vm339_vm2 = vcmask 60416   ;;  %s632_s1 = inlined_call_operand.vmem [shape: bf16[108,8], index: 1, kind: input, shape index: {}]   ;;  %s633_s0 = inlined_call_operand.vmem [shape: bf16[128,108], index: 0, kind: input, shape index: {}]   ;;  %s634_s2 = inlined_call_operand.vmem [shape: f32[1,8], index: 2, kind: input, shape index: {}]   ;;  %s635_s3 = inlined_call_operand.vmem [shape: bf16[128,8], index: 3, kind: output, shape index: {}]  }
   0x1   :  { %v477_v0 = vld [vmem:[%s632_s1] sm:$0xff]   ;;  %v478_v1 = vld [vmem:[%s632_s1 + $0x8] sm:$0xff]   ;;  %v479_v2 = vld [vmem:[%s632_s1 + $0x10] sm:$0xff]  }
   0x2   :  { %431 = vmatprep.subr.bf16.mxu0 %v477_v0  ;;  %461 = vmatprep.subr.bf16.mxu1 %v477_v0  ;;  %v480_v3 = vld [vmem:[%s632_s1 + $0x18] sm:$0xff]   ;;  %v484_v4 = vld [vmem:[%s633_s0] sm:$0xff]   ;;  %v482_v7 = vld [vmem:[%s632_s1 + $0x28] sm:$0xff]  }
   0x3   :  { %432 = vmatpush3.bf16.msra.mxu0 %v477_v0  ;;  %468 = vmatpush3.bf16.msra.mxu1 %v477_v0  ;;  %v485_v5 = vld [vmem:[%s633_s0 + $0x20] sm:$0xff]   ;;  %v483_v8 = vld [vmem:[%s632_s1 + $0x30] sm:$0x3f]   ;;  %v486_v10 = vld [vmem:[%s633_s0 + $0x8] sm:$0xff]  }
   0x4   :  { %433 = vmatprep.subr.bf16.mxu0 %v478_v1  ;;  %462 = vmatprep.subr.bf16.mxu1 %v478_v1  ;;  %v481_v6 = vld [vmem:[%s632_s1 + $0x20] sm:$0xff]   ;;  %v160_v9 = vsel %vm158_vm1, %v483_v8, 0  ;;  %v487_v11 = vld [vmem:[%s633_s0 + $0x28] sm:$0xff]   ;;  %v488_v12 = vld [vmem:[%s633_s0 + $0x10] sm:$0xff]  }
   0x5   :  { %445 = vmatprep.mubr.msk.bf16.mxu0 %vm133_vm0, %v484_v4  ;;  %453 = vmatprep.mubr.msk.bf16.mxu1 %vm133_vm0, %v485_v5  ;;  %v489_v13 = vld [vmem:[%s633_s0 + $0x30] sm:$0xff]   ;;  %v490_v14 = vld [vmem:[%s633_s0 + $0x18] sm:$0xff]   ;;  %v360_v16 = vld [vmem:[%s634_s2] ss:$0 sm:$0xff] }
   0x6   :  { %v491_v15 = vld [vmem:[%s633_s0 + $0x38] sm:$0xff]  }
   0x7   :  { %434 = vmatpush3.bf16.msra.mxu0 %v478_v1  ;;  %469 = vmatpush3.bf16.msra.mxu1 %v478_v1 }
   0x8   :  { %435 = vmatprep.subr.bf16.mxu0 %v479_v2  ;;  %463 = vmatprep.subr.bf16.mxu1 %v479_v2 }
   0xb   :  { %436 = vmatpush3.bf16.msra.mxu0 %v479_v2  ;;  %470 = vmatpush3.bf16.msra.mxu1 %v479_v2 }
   0xc   :  { %437 = vmatprep.subr.bf16.mxu0 %v480_v3  ;;  %464 = vmatprep.subr.bf16.mxu1 %v480_v3 }
   0xf   :  { %438 = vmatpush3.bf16.msra.mxu0 %v480_v3  ;;  %471 = vmatpush3.bf16.msra.mxu1 %v480_v3 }
  0x10   :  { %439 = vmatprep.subr.bf16.mxu0 %v481_v6  ;;  %465 = vmatprep.subr.bf16.mxu1 %v481_v6 }
  0x13   :  { %440 = vmatpush3.bf16.msra.mxu0 %v481_v6  ;;  %472 = vmatpush3.bf16.msra.mxu1 %v481_v6 }
  0x14   :  { %441 = vmatprep.subr.bf16.mxu0 %v482_v7  ;;  %466 = vmatprep.subr.bf16.mxu1 %v482_v7 }
  0x17   :  { %442 = vmatpush3.bf16.msra.mxu0 %v482_v7  ;;  %473 = vmatpush3.bf16.msra.mxu1 %v482_v7 }
  0x18   :  { %475 = vmatprep.subr.msk.bf16.mxu0 %vm158_vm1, %v483_v8  ;;  %476 = vmatprep.subr.msk.bf16.mxu1 %vm158_vm1, %v483_v8 }
  0x1b   :  { %444 = vmatpush3.bf16.msra.mxu0 %v160_v9  ;;  %474 = vmatpush3.bf16.msra.mxu1 %v160_v9 }
  0x1e   :  { %446 = vmatmul.mubr.msk.bf16.vlgmr.msra.gmra.mrb[0].mxu0 %vm133_vm0, %v486_v10  ;;  %454 = vmatmul.mubr.msk.bf16.vlgmr.msra.gmra.mrb[0].mxu1 %vm133_vm0, %v487_v11 }
  0x1f   :  { %449 = vmatprep.mubr.msk.bf16.mxu0 %vm133_vm0, %v488_v12  ;;  %457 = vmatprep.mubr.msk.bf16.mxu1 %vm133_vm0, %v489_v13 }
  0x26   :  { %450 = vmatmul.mubr.msk.bf16.gmra.mrb[4].mxu0 %vm133_vm0, %v490_v14  ;;  %458 = vmatmul.mubr.msk.bf16.gmra.mrb[4].mxu1 %vm133_vm0, %v491_v15 }
  0xf1   :  { %v447_v17 = vpop.f32.mrb[0].mxu0  ;;  %v455_v18 = vpop.f32.mrb[0].mxu1 }
  0xf2   :  { %v205_v19 = vadd.f32 %v447_v17, %v360_v16  ;;  %v237_v20 = vadd.f32 %v455_v18, %v360_v16  ;;  %v196_v21 = vpop.f32.mrb[1].mxu0  ;;  %v228_v22 = vpop.f32.mrb[1].mxu1 }
  0xf3   :  { %v197_v23 = vadd.f32 %v360_v16, %v196_v21  ;;  %v229_v24 = vadd.f32 %v360_v16, %v228_v22  ;;  %v448_v25 = vpop.f32.mrb[2].mxu0  ;;  %v456_v26 = vpop.f32.mrb[2].mxu1 }
  0xf4   :  { %v261_v27 = vmax.f32 %v205_v19, 0.0  ;;  %v269_v28 = vmax.f32 %v237_v20, 0.0  ;;  %v208_v29 = vadd.f32 %v448_v25, %v360_v16  ;;  %v240_v30 = vadd.f32 %v456_v26, %v360_v16  ;;  %v199_v31 = vpop.f32.mrb[3].mxu0  ;;  %v231_v32 = vpop.f32.mrb[3].mxu1 }
  0xf5   :  { %v259_v33 = vmax.f32 %v197_v23, 0.0  ;;  %v267_v34 = vmax.f32 %v229_v24, 0.0  ;;  %v200_v35 = vadd.f32 %v360_v16, %v199_v31  ;;  %v232_v36 = vadd.f32 %v360_v16, %v231_v32 }
  0xf6   :  { %v402_v37 = vpack.c.bf16 %v261_v27, %v261_v27  ;;  %v410_v38 = vpack.c.bf16 %v269_v28, %v269_v28  ;;  %v262_v39 = vmax.f32 %v208_v29, 0.0  ;;  %v270_v40 = vmax.f32 %v240_v30, 0.0 }
  0xf7   :  { %v400_v41 = vpack.c.bf16 %v259_v33, %v259_v33  ;;  %v408_v42 = vpack.c.bf16 %v267_v34, %v267_v34  ;;  %v260_v43 = vmax.f32 %v200_v35, 0.0  ;;  %v268_v44 = vmax.f32 %v232_v36, 0.0 }
  0xf8   :  { %342 = vst.msk [vmem:[%s635_s3 + $0x8] sm:$0xf] %vm339_vm2, %v402_v37  ;;  %350 = vst.msk [vmem:[%s635_s3 + $0x28] sm:$0xf] %vm339_vm2, %v410_v38  ;;  %v403_v45 = vpack.c.bf16 %v262_v39, %v262_v39  ;;  %v411_v46 = vpack.c.bf16 %v270_v40, %v270_v40 }
  0xf9   :  { %340 = vst.msk [vmem:[%s635_s3] sm:$0xf] %vm339_vm2, %v400_v41  ;;  %348 = vst.msk [vmem:[%s635_s3 + $0x20] sm:$0xf] %vm339_vm2, %v408_v42  ;;  %v401_v47 = vpack.c.bf16 %v260_v43, %v260_v43  ;;  %v409_v48 = vpack.c.bf16 %v268_v44, %v268_v44  ;;  %v451_v49 = vpop.f32.mrb[4].mxu0  ;;  %v459_v50 = vpop.f32.mrb[4].mxu1 }
  0xfa   :  { %343 = vst.msk [vmem:[%s635_s3 + $0xc] sm:$0xf] %vm339_vm2, %v403_v45  ;;  %351 = vst.msk [vmem:[%s635_s3 + $0x2c] sm:$0xf] %vm339_vm2, %v411_v46  ;;  %v221_v51 = vadd.f32 %v451_v49, %v360_v16  ;;  %v253_v52 = vadd.f32 %v459_v50, %v360_v16  ;;  %v212_v53 = vpop.f32.mrb[5].mxu0  ;;  %v244_v54 = vpop.f32.mrb[5].mxu1 }
  0xfb   :  { %341 = vst.msk [vmem:[%s635_s3 + $0x4] sm:$0xf] %vm339_vm2, %v401_v47  ;;  %349 = vst.msk [vmem:[%s635_s3 + $0x24] sm:$0xf] %vm339_vm2, %v409_v48  ;;  %v213_v55 = vadd.f32 %v360_v16, %v212_v53  ;;  %v245_v56 = vadd.f32 %v360_v16, %v244_v54  ;;  %v452_v57 = vpop.f32.mrb[6].mxu0  ;;  %v460_v58 = vpop.f32.mrb[6].mxu1 }
  0xfc   :  { %v265_v59 = vmax.f32 %v221_v51, 0.0  ;;  %v273_v60 = vmax.f32 %v253_v52, 0.0  ;;  %v224_v61 = vadd.f32 %v452_v57, %v360_v16  ;;  %v256_v62 = vadd.f32 %v460_v58, %v360_v16  ;;  %v215_v63 = vpop.f32.mrb[7].mxu0  ;;  %v247_v0 = vpop.f32.mrb[7].mxu1 }
  0xfd   :  { %v263_v1 = vmax.f32 %v213_v55, 0.0  ;;  %v271_v2 = vmax.f32 %v245_v56, 0.0  ;;  %v216_v3 = vadd.f32 %v360_v16, %v215_v63  ;;  %v248_v4 = vadd.f32 %v360_v16, %v247_v0 }
  0xfe   :  { %v406_v5 = vpack.c.bf16 %v265_v59, %v265_v59  ;;  %v414_v6 = vpack.c.bf16 %v273_v60, %v273_v60  ;;  %v266_v7 = vmax.f32 %v224_v61, 0.0  ;;  %v274_v8 = vmax.f32 %v256_v62, 0.0 }
  0xff   :  { %v404_v9 = vpack.c.bf16 %v263_v1, %v263_v1  ;;  %v412_v10 = vpack.c.bf16 %v271_v2, %v271_v2  ;;  %v264_v11 = vmax.f32 %v216_v3, 0.0  ;;  %v272_v12 = vmax.f32 %v248_v4, 0.0 }
 0x100   :  { %346 = vst.msk [vmem:[%s635_s3 + $0x18] sm:$0xf] %vm339_vm2, %v406_v5  ;;  %354 = vst.msk [vmem:[%s635_s3 + $0x38] sm:$0xf] %vm339_vm2, %v414_v6  ;;  %v407_v13 = vpack.c.bf16 %v266_v7, %v266_v7  ;;  %v415_v14 = vpack.c.bf16 %v274_v8, %v274_v8 }
 0x101   :  { %344 = vst.msk [vmem:[%s635_s3 + $0x10] sm:$0xf] %vm339_vm2, %v404_v9  ;;  %352 = vst.msk [vmem:[%s635_s3 + $0x30] sm:$0xf] %vm339_vm2, %v412_v10  ;;  %v405_v15 = vpack.c.bf16 %v264_v11, %v264_v11  ;;  %v413_v16 = vpack.c.bf16 %v272_v12, %v272_v12 }
 0x102   :  { %347 = vst.msk [vmem:[%s635_s3 + $0x1c] sm:$0xf] %vm339_vm2, %v407_v13  ;;  %355 = vst.msk [vmem:[%s635_s3 + $0x3c] sm:$0xf] %vm339_vm2, %v415_v14 }
 0x103   :  { %345 = vst.msk [vmem:[%s635_s3 + $0x14] sm:$0xf] %vm339_vm2, %v405_v15  ;;  %353 = vst.msk [vmem:[%s635_s3 + $0x34] sm:$0xf] %vm339_vm2, %v413_v16 }

</bundles_post_ra>
